<compile_context>
chip_gen: v6e
topology: v6e:2x2x1
jax: 0.10.0
libtpu: 0.0.40
codegen_flags: <defaults>
</compile_context>

<pallas_src>
import jax
import jax.numpy as jnp
from jax.experimental import pallas as pl
from jax.experimental.pallas import tpu as pltpu

EPS = 1e-5


def _make_ibn_kernel(half1: int, c_tile: int, hw: int, n: int):
    inv_hw = 1.0 / float(hw)
    inv_nhw = 1.0 / float(n * hw)

    def ibn_kernel(x_ref, gamma_ref, beta_ref, o_ref):
        # x block: (N, c_tile, HW); compute in f32 regardless of I/O dtype.
        x = x_ref[...].astype(jnp.float32)

        # Single fused reduction pass over the lane (HW) axis: sum and sum-of-squares.
        s = jnp.sum(x, axis=-1, keepdims=True)        # (N, c_tile, 1)
        ss = jnp.sum(x * x, axis=-1, keepdims=True)   # (N, c_tile, 1)

        # InstanceNorm stats: per (n, c), biased variance.
        mean_in = s * inv_hw
        var_in = jnp.maximum(ss * inv_hw - mean_in * mean_in, 0.0)

        # BatchNorm stats: per channel over (N, HW), biased variance (training-mode BN).
        mean_bn = jnp.sum(s, axis=0, keepdims=True) * inv_nhw                     # (1, c_tile, 1)
        var_bn = jnp.maximum(
            jnp.sum(ss, axis=0, keepdims=True) * inv_nhw - mean_bn * mean_bn, 0.0)

        # Per-channel mode: global channel index < half1 -> InstanceNorm else BatchNorm.
        ch = (jax.lax.broadcasted_iota(jnp.int32, (1, c_tile, 1), 1)
              + pl.program_id(0) * c_tile)
        is_in = ch < half1                                                        # (1, c_tile, 1)

        mean = jnp.where(is_in, mean_in, mean_bn)                                 # (N, c_tile, 1)
        var = jnp.where(is_in, var_in, var_bn)                                    # (N, c_tile, 1)

        # Fold affine into per-channel scale/shift:  y = x * scale + shift
        gamma = gamma_ref[...][None, :, :].astype(jnp.float32)                    # (1, c_tile, 1)
        beta = beta_ref[...][None, :, :].astype(jnp.float32)                      # (1, c_tile, 1)
        scale = gamma * jax.lax.rsqrt(var + EPS)
        shift = beta - mean * scale

        # Full-block, lane-dense store (no in-kernel channel sub-slicing).
        o_ref[...] = (x * scale + shift).astype(o_ref.dtype)

    return ibn_kernel


def _pick_c_tile(N: int, C: int, HW: int, itemsize: int,
                 max_block_bytes: int = 4 * 1024 * 1024) -> int:
    """Largest 8-aligned divisor of C whose (N, c_tile, HW) block stays within budget.

    Budget is sized so in+out double-buffers plus f32 temporaries stay well under the
    v7x scoped VMEM limit; v5e/v6e simply have more headroom.
    """
    bytes_per_channel = N * HW * max(itemsize, 4)  # f32 temporaries dominate
    aligned = [d for d in range(8, C + 1, 8) if C % d == 0]
    fitting = [d for d in aligned if d * bytes_per_channel <= max_block_bytes]
    if fitting:
        return max(fitting)
    if aligned:
        return min(aligned)   # smallest aligned tile; vmem_limit gives extra headroom
    return C                  # tiny / unaligned channel count: single full-channel block


def ibn_forward(x_nchw, gamma_in, beta_in, gamma_bn, beta_bn, half1: int, *, c_tile=None):
    """x_nchw: (N, C, H, W). Returns (N, C, H, W) with IBN applied (training-mode BN)."""
    N, C, H, W = x_nchw.shape
    HW = H * W
    half2 = C - half1
    assert gamma_in.shape == (half1,) and gamma_bn.shape == (half2,)

    # Note: if HW is not a multiple of 128 (e.g. 56*56=3136) the last lane column is masked;
    # correctness is unaffected since the block spans the full HW axis.
    x3 = x_nchw.reshape(N, C, HW)

    # Concatenate per-channel affine params into (C, 1) arrays (channel on sublanes).
    gamma = jnp.concatenate([gamma_in, gamma_bn]).reshape(C, 1).astype(jnp.float32)
    beta = jnp.concatenate([beta_in, beta_bn]).reshape(C, 1).astype(jnp.float32)

    if c_tile is None:
        c_tile = _pick_c_tile(N, C, HW, jnp.dtype(x3.dtype).itemsize)
    assert C % c_tile == 0, "c_tile must divide C"
    grid = (C // c_tile,)

    out3 = pl.pallas_call(
        _make_ibn_kernel(half1, c_tile, HW, N),
        out_shape=jax.ShapeDtypeStruct((N, C, HW), x3.dtype),
        grid=grid,
        in_specs=[
            pl.BlockSpec((N, c_tile, HW), lambda c: (0, c, 0)),
            pl.BlockSpec((c_tile, 1), lambda c: (c, 0)),
            pl.BlockSpec((c_tile, 1), lambda c: (c, 0)),
        ],
        out_specs=pl.BlockSpec((N, c_tile, HW), lambda c: (0, c, 0)),
        compiler_params=pltpu.CompilerParams(
            dimension_semantics=("parallel",),          # shards channel tiles across TCs on v7x
            vmem_limit_bytes=48 * 1024 * 1024,          # < 64 MiB physical on v7x
        ),
    )(x3, gamma, beta)

    return out3.reshape(N, C, H, W)


def _reference_ibn(x, gamma_in, beta_in, gamma_bn, beta_bn, half1):
    """Pure-JAX reference matching PyTorch IBN forward (training-mode BN)."""
    x_in = x[:, :half1]
    x_bn = x[:, half1:]
    mu = jnp.mean(x_in, axis=(2, 3), keepdims=True)
    var = jnp.mean((x_in - mu) ** 2, axis=(2, 3), keepdims=True)
    y_in = (x_in - mu) / jnp.sqrt(var + EPS)
    y_in = y_in * gamma_in[None, :, None, None] + beta_in[None, :, None, None]

    mu_b = jnp.mean(x_bn, axis=(0, 2, 3), keepdims=True)
    var_b = jnp.mean((x_bn - mu_b) ** 2, axis=(0, 2, 3), keepdims=True)
    y_bn = (x_bn - mu_b) / jnp.sqrt(var_b + EPS)
    y_bn = y_bn * gamma_bn[None, :, None, None] + beta_bn[None, :, None, None]
    return jnp.concatenate([y_in, y_bn], axis=1)


if __name__ == "__main__":
    key = jax.random.PRNGKey(0)
    k1, k2 = jax.random.split(key)

    # --- Case 1: tiny shape implied by the module (planes=4 -> half=2), single block. ---
    planes, N, H, W = 4, 2, 16, 16
    half1 = planes // 2
    half2 = planes - half1
    x = jax.random.normal(k1, (N, planes, H, W), dtype=jnp.float32)
    gamma_in = jnp.linspace(0.8, 1.2, half1, dtype=jnp.float32)
    beta_in = jnp.linspace(-0.1, 0.1, half1, dtype=jnp.float32)
    gamma_bn = jnp.linspace(0.9, 1.1, half2, dtype=jnp.float32)
    beta_bn = jnp.linspace(-0.05, 0.05, half2, dtype=jnp.float32)

    out = jax.block_until_ready(ibn_forward(x, gamma_in, beta_in, gamma_bn, beta_bn, half1))
    ref = _reference_ibn(x, gamma_in, beta_in, gamma_bn, beta_bn, half1)
    assert out.shape == (N, planes, H, W)
    assert jnp.allclose(out, ref, atol=1e-4, rtol=1e-4), "mismatch vs reference (case 1)"

    # --- Case 2: multi-step channel-tiled path, including a block straddling the IN/BN
    #     boundary (planes=24, half=12, c_tile=8 -> block 1 mixes IN and BN channels). ---
    planes, N, H, W = 24, 2, 16, 16
    half1 = planes // 2
    half2 = planes - half1
    x = jax.random.normal(k2, (N, planes, H, W), dtype=jnp.float32)
    gamma_in = jnp.linspace(0.8, 1.2, half1, dtype=jnp.float32)
    beta_in = jnp.linspace(-0.1, 0.1, half1, dtype=jnp.float32)
    gamma_bn = jnp.linspace(0.9, 1.1, half2, dtype=jnp.float32)
    beta_bn = jnp.linspace(-0.05, 0.05, half2, dtype=jnp.float32)

    out = jax.block_until_ready(
        ibn_forward(x, gamma_in, beta_in, gamma_bn, beta_bn, half1, c_tile=8))
    ref = _reference_ibn(x, gamma_in, beta_in, gamma_bn, beta_bn, half1)
    assert jnp.allclose(out, ref, atol=1e-4, rtol=1e-4), "mismatch vs reference (case 2)"

    print("KERNEL_OK")
</pallas_src>

<mosaic_0001>
module attributes {stable_mosaic.version = 11 : i64} {
  func.func @ibn_kernel(%arg0: i32, %arg1: memref<2x4x256xf32, #tpu.memory_space<vmem>>, %arg2: memref<4x1xf32, #tpu.memory_space<vmem>>, %arg3: memref<4x1xf32, #tpu.memory_space<vmem>>, %arg4: memref<2x4x256xf32, #tpu.memory_space<vmem>>) attributes {dimension_semantics = [#tpu.dimension_semantics<parallel>], iteration_bounds = array<i64: 1>, scalar_prefetch = 0 : i64, scratch_operands = 0 : i64, tpu.core_type = #tpu.core_type<tc>, window_params = [{transform_indices = @transform_0, window_bounds = array<i64: 2, 4, 256>}, {transform_indices = @transform_1, window_bounds = array<i64: 4, 1>}, {transform_indices = @transform_2, window_bounds = array<i64: 4, 1>}, {transform_indices = @transform_3, window_bounds = array<i64: 2, 4, 256>}]} {
    %c0 = arith.constant 0 : index
    %c0_0 = arith.constant 0 : index
    %c0_1 = arith.constant 0 : index
    %0 = vector.load %arg1[%c0, %c0_0, %c0_1] : memref<2x4x256xf32, #tpu.memory_space<vmem>>, vector<2x4x256xf32>
    %cst = arith.constant dense<0.000000e+00> : vector<2x4xf32>
    %1 = vector.multi_reduction <add>, %0, %cst [2] : vector<2x4x256xf32> to vector<2x4xf32>
    %2 = vector.shape_cast %1 : vector<2x4xf32> to vector<2x4x1xf32>
    %3 = arith.mulf %0, %0 : vector<2x4x256xf32>
    %cst_2 = arith.constant dense<0.000000e+00> : vector<2x4xf32>
    %4 = vector.multi_reduction <add>, %3, %cst_2 [2] : vector<2x4x256xf32> to vector<2x4xf32>
    %5 = vector.shape_cast %4 : vector<2x4xf32> to vector<2x4x1xf32>
    %cst_3 = arith.constant 3.906250e-03 : f32
    %6 = vector.broadcast %cst_3 : f32 to vector<2x4x1xf32>
    %7 = arith.mulf %2, %6 : vector<2x4x1xf32>
    %cst_4 = arith.constant 3.906250e-03 : f32
    %8 = vector.broadcast %cst_4 : f32 to vector<2x4x1xf32>
    %9 = arith.mulf %5, %8 : vector<2x4x1xf32>
    %10 = arith.mulf %7, %7 : vector<2x4x1xf32>
    %11 = arith.subf %9, %10 : vector<2x4x1xf32>
    %cst_5 = arith.constant 0.000000e+00 : f32
    %12 = vector.broadcast %cst_5 : f32 to vector<2x4x1xf32>
    %13 = arith.maximumf %11, %12 : vector<2x4x1xf32>
    %cst_6 = arith.constant dense<0.000000e+00> : vector<4x1xf32>
    %14 = vector.multi_reduction <add>, %2, %cst_6 [0] : vector<2x4x1xf32> to vector<4x1xf32>
    %15 = vector.shape_cast %14 : vector<4x1xf32> to vector<1x4x1xf32>
    %cst_7 = arith.constant 0.001953125 : f32
    %16 = vector.broadcast %cst_7 : f32 to vector<1x4x1xf32>
    %17 = arith.mulf %15, %16 : vector<1x4x1xf32>
    %cst_8 = arith.constant dense<0.000000e+00> : vector<4x1xf32>
    %18 = vector.multi_reduction <add>, %5, %cst_8 [0] : vector<2x4x1xf32> to vector<4x1xf32>
    %19 = vector.shape_cast %18 : vector<4x1xf32> to vector<1x4x1xf32>
    %cst_9 = arith.constant 0.001953125 : f32
    %20 = vector.broadcast %cst_9 : f32 to vector<1x4x1xf32>
    %21 = arith.mulf %19, %20 : vector<1x4x1xf32>
    %22 = arith.mulf %17, %17 : vector<1x4x1xf32>
    %23 = arith.subf %21, %22 : vector<1x4x1xf32>
    %cst_10 = arith.constant 0.000000e+00 : f32
    %24 = vector.broadcast %cst_10 : f32 to vector<1x4x1xf32>
    %25 = arith.maximumf %23, %24 : vector<1x4x1xf32>
    %26 = tpu.iota {dimensions = array<i32: 1>} : vector<1x4x1xi32>
    %c4_i32 = arith.constant 4 : i32
    %27 = arith.muli %arg0, %c4_i32 : i32
    %28 = vector.broadcast %27 : i32 to vector<1x4x1xi32>
    %29 = arith.addi %26, %28 : vector<1x4x1xi32>
    %c2_i32 = arith.constant 2 : i32
    %30 = vector.broadcast %c2_i32 : i32 to vector<1x4x1xi32>
    %31 = arith.cmpi slt, %29, %30 : vector<1x4x1xi32>
    %32 = vector.shape_cast %31 : vector<1x4x1xi1> to vector<1x4x1xi1>
    %33 = vector.broadcast %32 : vector<1x4x1xi1> to vector<2x4x1xi1>
    %34 = vector.shape_cast %17 : vector<1x4x1xf32> to vector<1x4x1xf32>
    %35 = vector.broadcast %34 : vector<1x4x1xf32> to vector<2x4x1xf32>
    %36 = arith.select %33, %7, %35 : vector<2x4x1xi1>, vector<2x4x1xf32>
    %37 = vector.shape_cast %31 : vector<1x4x1xi1> to vector<1x4x1xi1>
    %38 = vector.broadcast %37 : vector<1x4x1xi1> to vector<2x4x1xi1>
    %39 = vector.shape_cast %25 : vector<1x4x1xf32> to vector<1x4x1xf32>
    %40 = vector.broadcast %39 : vector<1x4x1xf32> to vector<2x4x1xf32>
    %41 = arith.select %38, %13, %40 : vector<2x4x1xi1>, vector<2x4x1xf32>
    %c0_11 = arith.constant 0 : index
    %c0_12 = arith.constant 0 : index
    %42 = vector.load %arg2[%c0_11, %c0_12] : memref<4x1xf32, #tpu.memory_space<vmem>>, vector<4x1xf32>
    %43 = vector.shape_cast %42 : vector<4x1xf32> to vector<1x4x1xf32>
    %c0_13 = arith.constant 0 : index
    %c0_14 = arith.constant 0 : index
    %44 = vector.load %arg3[%c0_13, %c0_14] : memref<4x1xf32, #tpu.memory_space<vmem>>, vector<4x1xf32>
    %45 = vector.shape_cast %44 : vector<4x1xf32> to vector<1x4x1xf32>
    %cst_15 = arith.constant 9.99999974E-6 : f32
    %46 = vector.broadcast %cst_15 : f32 to vector<2x4x1xf32>
    %47 = arith.addf %41, %46 : vector<2x4x1xf32>
    %48 = math.rsqrt %47 : vector<2x4x1xf32>
    %49 = vector.broadcast %43 : vector<1x4x1xf32> to vector<2x4x1xf32>
    %50 = arith.mulf %49, %48 : vector<2x4x1xf32>
    %51 = arith.mulf %36, %50 : vector<2x4x1xf32>
    %52 = vector.broadcast %45 : vector<1x4x1xf32> to vector<2x4x1xf32>
    %53 = arith.subf %52, %51 : vector<2x4x1xf32>
    %54 = vector.broadcast %50 : vector<2x4x1xf32> to vector<2x4x256xf32>
    %55 = arith.mulf %0, %54 : vector<2x4x256xf32>
    %56 = vector.broadcast %53 : vector<2x4x1xf32> to vector<2x4x256xf32>
    %57 = arith.addf %55, %56 : vector<2x4x256xf32>
    %c0_16 = arith.constant 0 : index
    %c0_17 = arith.constant 0 : index
    %c0_18 = arith.constant 0 : index
    %58 = vector.load %arg4[%c0_16, %c0_17, %c0_18] : memref<2x4x256xf32, #tpu.memory_space<vmem>>, vector<2x4x256xf32>
    tpu.vector_store %arg4[%c0_16, %c0_17, %c0_18], %57 {strides = array<i32>} : memref<2x4x256xf32, #tpu.memory_space<vmem>>, vector<2x4x256xf32>,
    return
  }
  func.func @transform_0(%arg0: i32) -> (i32, i32, i32) {
    %c0_i32 = arith.constant 0 : i32
    %c0_i32_0 = arith.constant 0 : i32
    %c0_i32_1 = arith.constant 0 : i32
    return %c0_i32, %arg0, %c0_i32_0 : i32, i32, i32
  }
  func.func @transform_1(%arg0: i32) -> (i32, i32) {
    %c0_i32 = arith.constant 0 : i32
    %c0_i32_0 = arith.constant 0 : i32
    return %arg0, %c0_i32 : i32, i32
  }
  func.func @transform_2(%arg0: i32) -> (i32, i32) {
    %c0_i32 = arith.constant 0 : i32
    %c0_i32_0 = arith.constant 0 : i32
    return %arg0, %c0_i32 : i32, i32
  }
  func.func @transform_3(%arg0: i32) -> (i32, i32, i32) {
    %c0_i32 = arith.constant 0 : i32
    %c0_i32_0 = arith.constant 0 : i32
    %c0_i32_1 = arith.constant 0 : i32
    return %c0_i32, %arg0, %c0_i32_0 : i32, i32, i32
  }
}

</mosaic_0001>

<bundles_post_ra>
// kernel: tpu_custom_call.1
= control target key start
LH: loop header
LB: loop body
LE: loop exit
PB: predicated region body
PF: predicated region fallthrough
CT: control target
= control target key end

     0   :  { %8 = vsyncpa [#allocation3], 0  ;;  %s316_s0 = inlined_call_operand.hbm [shape: f32[2,4,256], index: 0, kind: input, shape index: {}]   ;;  %s317_s1 = inlined_call_operand.vmem [shape: f32[4,1], index: 1, kind: input, shape index: {}]   ;;  %s318_s2 = inlined_call_operand.vmem [shape: f32[4,1], index: 2, kind: input, shape index: {}]   ;;  %s319_s3 = inlined_call_operand.hbm [shape: f32[2,4,256], index: 3, kind: output, shape index: {}]  }
   0x1   :  { %9 = vsyncpa [#allocation4], 0  ;;  %s240_s12 = smov [#allocation2]  }
   0x2   :  { %s15_s13 = sshll.u32 %s240_s12, 4  ;;  %s16_s13 = int_to_ptr.vmem [resolvable:$true] %s15_s13 }
   0x3   :  { %s204_s14 = scalar_lea.vmem %s16_s13, 256  ;;  %p209_p1 = scmp.lt.s32.totalorder %s16_s13, %s16_s13 }
   0x4   :  { %p205_p0 = scmp.ne.s32.totalorder %s16_s13, %s204_s14  ;;  %p210_p2 = scmp.lt.s32.totalorder %s204_s14, %s204_s14 }
   0x6   :  { %p211_p3 = por %p210_p2, %p209_p1 }
   0x8   :  { %p212_p4 = pnand %p211_p3, %p205_p0 }
   0xa   :  { %215 = shalt.err (!%p212_p4)
}
   0xb   :  { %s241_s15 = smov 128   ;;  %s242_s16 = smov 8  }
   0xc   :  { %21 = dma.hbm_to_vmem [thread:$0]  %s316_s0, 256, %s16_s13, [#allocation3], %s241_s15, %s241_s15, %s242_s16  }
   0xd   :  { %236 = dma.done.wait [#allocation3], 256  }
   0xe   :  { %237 = vsyncadd [#allocation3], 4294967040  ;;  %vm37_vm0 = vcmask 1043456   ;;  %v272_v0 = vld [vmem:[#allocation2] sm:$0xff]  ;;  %v274_v1 = vld [vmem:[#allocation2 + $0x8] sm:$0xff]  ;;  %v243_v20 = vmov 0   ;;  %v87_v30 = vlaneseq }
   0xf   :  { %v33_v2 = vcombine.high %v272_v0, %v272_v0  ;;  %v38_v3 = vsel %vm37_vm0, %v272_v0, 0.0  ;;  %v48_v4 = vmul.f32 %v272_v0, %v272_v0  ;;  %v34_v5 = vcombine.high %v274_v1, %v274_v1  ;;  %189 = vset.pattern.permute.xlu1 %v243_v20  ;;  %188 = vset.pattern.permute.xlu0 %v243_v20  ;;  %v99_v52 = vld [vmem:[%s317_s1] sm:$0xf]  ;;  %s245_s1 = smov [#allocation5]  }
  0x10   :  { %v43_v6 = vsel %vm37_vm0, %v274_v1, 0.0  ;;  %v49_v7 = vmul.f32 %v274_v1, %v274_v1  ;;  %v88_v43 = vshrl.u32 %v87_v30, 7  ;;  %v100_v58 = vld [vmem:[%s318_s2] sm:$0xf]  ;;  %s170_s2 = sshll.u32 %s245_s1, 4  ;;  %s171_s2 = int_to_ptr.vmem [resolvable:$true] %s170_s2 }
  0x11   :  { %v39_v8 = vsel %vm37_vm0, %v33_v2, 0.0  ;;  %v52_v9 = vcombine.high %v48_v4, %v48_v4  ;;  %v56_v10 = vsel %vm37_vm0, %v48_v4, 0.0  ;;  %v44_v11 = vsel %vm37_vm0, %v34_v5, 0.0  ;;  %s216_s22 = scalar_lea.vmem %s171_s2, 256  ;;  %p221_p6 = scmp.lt.s32.totalorder %s171_s2, %s171_s2 }
  0x12   :  { %v40_v12 = vadd.f32 %v39_v8, %v38_v3  ;;  %v53_v13 = vcombine.high %v49_v7, %v49_v7  ;;  %v61_v15 = vsel %vm37_vm0, %v49_v7, 0.0  ;;  %v45_v17 = vadd.f32 %v44_v11, %v43_v6  ;;  %p217_p5 = scmp.ne.s32.totalorder %s171_s2, %s216_s22  ;;  %p222_p7 = scmp.lt.s32.totalorder %s216_s22, %s216_s22 }
  0x13   :  { %v57_v14 = vsel %vm37_vm0, %v52_v9, 0.0  ;;  %vm92_vm1 = vcmp.lt.s32.totalorder %v88_v43, 2  ;;  %v244_v2 = vmov 839922192  }
  0x14   :  { %41 = vadd.xlane.f32.xlu0 %v40_v12  ;;  %v58_v16 = vadd.f32 %v57_v14, %v56_v10  ;;  %v62_v18 = vsel %vm37_vm0, %v53_v13, 0.0  ;;  %v120_v3 = vunpack.c.l.s4 %v244_v2  ;;  %p223_p8 = por %p222_p7, %p221_p6 }
  0x15   :  { %v63_v19 = vadd.f32 %v62_v18, %v61_v15 }
  0x16   :  { %59 = vadd.xlane.f32.xlu1 %v58_v16  ;;  %v121_v4 = vunpack.c.0.s8 %v120_v3  ;;  %p224_p9 = pnand %p223_p8, %p217_p5 }
  0x18   :  { %46 = vadd.xlane.f32.xlu0 %v45_v17  ;;  %v124_v5 = vsub.s32 %v121_v4, %v88_v43 }
  0x1a   :  { %64 = vadd.xlane.f32.xlu1 %v63_v19 }
  0x9d   :  { %v42_v21 = vpop.xlane.xlu0 %41 }
  0x9e   :  { %v66_v22 = vmul.f32 0.00390625, %v42_v21  ;;  %v76_v25 = vsel %vm37_vm0, %v42_v21, 0.0 }
  0x9f   :  { %v60_v23 = vpop.xlane.xlu1 %59 }
  0xa0   :  { %v70_v28 = vmul.f32 %v66_v22, %v66_v22  ;;  %v68_v29 = vmul.f32 0.00390625, %v60_v23  ;;  %v80_v33 = vsel %vm37_vm0, %v60_v23, 0.0 }
  0xa1   :  { %v47_v24 = vpop.xlane.xlu0 %46 }
  0xa2   :  { %v67_v26 = vmul.f32 0.00390625, %v47_v24  ;;  %v77_v27 = vsel %vm37_vm0, %v47_v24, 0.0  ;;  %v72_v39 = vsub.f32 %v68_v29, %v70_v28 }
  0xa3   :  { %v78_v31 = vadd.f32 %v77_v27, %v76_v25  ;;  %v65_v32 = vpop.xlane.xlu1 %64 }
  0xa4   :  { %v71_v34 = vmul.f32 %v67_v26, %v67_v26  ;;  %v69_v35 = vmul.f32 0.00390625, %v65_v32  ;;  %v81_v36 = vsel %vm37_vm0, %v65_v32, 0.0  ;;  %v74_v45 = vmax.f32 %v72_v39, 0.0 }
  0xa5   :  { %v79_v37 = vmul.f32 0.001953125, %v78_v31  ;;  %v82_v38 = vadd.f32 %v81_v36, %v80_v33 }
  0xa6   :  { %v73_v40 = vsub.f32 %v69_v35, %v71_v34 }
  0xa7   :  { %v83_v41 = vmul.f32 0.001953125, %v82_v38  ;;  %v84_v42 = vmul.f32 %v79_v37, %v79_v37  ;;  %v95_v57 = vsel %vm92_vm1, %v66_v22, %v79_v37  ;;  %v96_v60 = vsel %vm92_vm1, %v67_v26, %v79_v37 }
  0xa8   :  { %v75_v46 = vmax.f32 %v73_v40, 0.0 }
  0xa9   :  { %v85_v44 = vsub.f32 %v83_v41, %v84_v42 }
  0xab   :  { %v86_v47 = vmax.f32 %v85_v44, 0.0 }
  0xad   :  { %v97_v48 = vsel %vm92_vm1, %v74_v45, %v86_v47  ;;  %v98_v49 = vsel %vm92_vm1, %v75_v46, %v86_v47 }
  0xae   :  { %v101_v50 = vadd.f32 1e-05, %v97_v48  ;;  %v102_v51 = vadd.f32 1e-05, %v98_v49 }
  0xb0   :  { %192 = vrsqrt.f32 %v101_v50 }
  0xb1   :  { %194 = vrsqrt.f32 %v102_v51 }
  0xbd   :  { %v193_v53 = vpop.eup %192 }
  0xbe   :  { %v195_v54 = vpop.eup %194  ;;  %v105_v55 = vmul.f32 %v193_v53, %v99_v52 }
  0xbf   :  { %v106_v56 = vmul.f32 %v195_v54, %v99_v52 }
  0xc0   :  { %113 = vperm.xlu0 %188, %v105_v55   ;;  %v107_v59 = vmul.f32 %v105_v55, %v95_v57 }
  0xc1   :  { %117 = vperm.xlu1 %189, %v106_v56   ;;  %v108_v62 = vmul.f32 %v106_v56, %v96_v60 }
  0xc2   :  { %v109_v61 = vsub.f32 %v100_v58, %v107_v59 }
  0xc3   :  { %v110_v63 = vsub.f32 %v100_v58, %v108_v62 }
  0xc5   :  { %139 = vperm.xlu1 %189, %v109_v61  }
  0xc9   :  { %143 = vperm.xlu1 %189, %v110_v63  }
 0x13b   :  { %v114_v6 = vpop.permute.xlu0 %113 }
 0x13c   :  { %v118_v7 = vpop.permute.xlu1 %117  ;;  %v125_v8 = vrot.slane %v114_v6, %v124_v5 }
 0x13d   :  { %v132_v10 = vrot.slane %v118_v7, %v124_v5 }
 0x13e   :  { %v135_v11 = vmul.f32 %v125_v8, %v272_v0 }
 0x13f   :  { %v136_v15 = vmul.f32 %v132_v10, %v274_v1 }
 0x140   :  { %v140_v9 = vpop.permute.xlu1 %139 }
 0x141   :  { %v151_v12 = vrot.slane %v140_v9, %v124_v5 }
 0x143   :  { %v161_v13 = vadd.f32 %v151_v12, %v135_v11 }
 0x144   :  { %v144_v14 = vpop.permute.xlu1 %143 }
 0x145   :  { %163 = vst [vmem:[#allocation5] sm:$0xff] %v161_v13  ;;  %v158_v16 = vrot.slane %v144_v14, %v124_v5 }
 0x147   :  { %v162_v17 = vadd.f32 %v158_v16, %v136_v15 }
 0x149   :  { %164 = vst [vmem:[#allocation5 + $0x8] sm:$0xff] %v162_v17 }
 0x14a   :  { %227 = shalt.err (!%p224_p9)
}
 0x14b   :  { %176 = dma.vmem_to_hbm [thread:$0]  %s171_s2, 256, %s319_s3, [#allocation4], %s241_s15, %s241_s15, %s242_s16  }
 0x14c   :  { %238 = dma.done.wait [#allocation4], 256  }
 0x14d   :  { %239 = vsyncadd [#allocation4], 4294967040 }
 0x14e   :  { %180 = vsyncpa [#allocation3], 1 }
 0x14f   :  { %181 = vsyncpa [#allocation4], 1 }

</bundles_post_ra>
